<compile_context>
chip_gen: v7x
topology: tpu7x:2x2x1
jax: 0.10.0
libtpu: 0.0.40
codegen_flags: <defaults>
</compile_context>

<pallas_src>
import jax
import jax.numpy as jnp
from jax.experimental import pallas as pl
from jax.experimental.pallas import tpu as pltpu


def _round_up(n, m):
    return ((n + m - 1) // m) * m


def _encoder_kernel(x_ref, w1_ref, b1_ref, w21_ref, b21_ref, w22_ref, b22_ref,
                    zloc_ref, zscale_ref):
    # x:   [TB, 784] f32 (HBM is read once as f32; bf16 cast happens here)
    # w1:  [784, H]  bf16 ; b1:  [1, H]  f32
    # w21: [H, Z]    f32  ; b21: [1, Z]  f32
    # w22: [H, Z]    f32  ; b22: [1, Z]  f32
    # outputs: z_loc [TB, Z] f32, z_scale [TB, Z] f32

    # fc1 on the MXU: bf16 operands (single-pass), f32 accumulation.
    x_bf = x_ref[...].astype(jnp.bfloat16)
    h = jnp.dot(x_bf, w1_ref[...], preferred_element_type=jnp.float32)
    h = h + b1_ref[...]
    h = jnp.where(h > 0, h, 0.01 * h)  # LeakyReLU, negative_slope = 0.01

    # Two tiny heads (K=H, N=Z): MXU has huge slack here, so two separate
    # matmuls keep the stores direct (no lane slicing, no wrapper split).
    zloc = jnp.dot(h, w21_ref[...], preferred_element_type=jnp.float32) + b21_ref[...]
    zscale = jnp.exp(
        jnp.dot(h, w22_ref[...], preferred_element_type=jnp.float32) + b22_ref[...]
    )  # exp runs on the EUP (idle slot relative to the DMA/MXU path)

    zloc_ref[...] = zloc.astype(zloc_ref.dtype)
    zscale_ref[...] = zscale.astype(zscale_ref.dtype)


def encoder_forward(x, params, *, block_b=2048):
    """x: [B, 1, 28, 28] (NCHW) or [B, 784] float32. Returns (z_loc, z_scale) f32.

    block_b: max batch-tile size. 2048 is safe on all generations with the
    32 MiB vmem_limit below; v6e/v7x callers may pass 4096.
    """
    w1, b1, w21, b21, w22, b22 = params
    x2d = x.reshape(-1, 784)
    B = x2d.shape[0]
    H = w1.shape[1]
    Z = w21.shape[1]

    # Tiny resident fc1 weight shipped as bf16 (one-time ~100 KB cast);
    # everything else stays f32.
    w1_bf = w1.astype(jnp.bfloat16)

    # Batch tile selection (all static Python):
    #  * tiny B: single block equal to the full batch (always layout-legal);
    #  * otherwise: multiple of 16 sublanes, capped at block_b, sized so the
    #    grid has >= 2 steps (v7x megacore gets work on both TCs) and an even
    #    step count where cheap to arrange.
    # No padding of x and no output slicing: the ragged last block is handled
    # by Pallas (OOB reads are garbage rows that are never stored; OOB writes
    # are masked).
    if B <= 32:
        tb = B
    else:
        tb = min(block_b, _round_up(pl.cdiv(B, 2), 16))
        nsteps = pl.cdiv(B, tb)
        if nsteps > 1 and nsteps % 2 == 1:
            tb = _round_up(pl.cdiv(B, nsteps + 1), 16)
    grid = (pl.cdiv(B, tb),)

    z_loc, z_scale = pl.pallas_call(
        _encoder_kernel,
        out_shape=(
            jax.ShapeDtypeStruct((B, Z), jnp.float32),
            jax.ShapeDtypeStruct((B, Z), jnp.float32),
        ),
        grid=grid,
        in_specs=[
            pl.BlockSpec((tb, 784), lambda i: (i, 0)),   # x: blocked over batch
            pl.BlockSpec((784, H), lambda i: (0, 0)),    # w1: resident
            pl.BlockSpec((1, H), lambda i: (0, 0)),      # b1: resident
            pl.BlockSpec((H, Z), lambda i: (0, 0)),      # w21: resident
            pl.BlockSpec((1, Z), lambda i: (0, 0)),      # b21: resident
            pl.BlockSpec((H, Z), lambda i: (0, 0)),      # w22: resident
            pl.BlockSpec((1, Z), lambda i: (0, 0)),      # b22: resident
        ],
        out_specs=(
            pl.BlockSpec((tb, Z), lambda i: (i, 0)),
            pl.BlockSpec((tb, Z), lambda i: (i, 0)),
        ),
        compiler_params=pltpu.CompilerParams(
            dimension_semantics=("parallel",),           # megacore split on v7x
            vmem_limit_bytes=32 * 1024 * 1024,           # covers v5e's 16 MiB default
        ),
    )(x2d, w1_bf, b1, w21, b21, w22, b22)

    return z_loc, z_scale


def init_params(key, z_dim, hidden_dim):
    """Deterministic init mimicking nn.Linear default (U[-1/sqrt(fan_in), +])."""
    k1, k2, k3, k4, k5, k6 = jax.random.split(key, 6)

    def linear(kw, kb, fan_in, fan_out):
        bound = 1.0 / jnp.sqrt(fan_in)
        # stored as [in, out] (transposed vs. PyTorch's [out, in])
        w = jax.random.uniform(kw, (fan_in, fan_out), jnp.float32, -bound, bound)
        b = jax.random.uniform(kb, (1, fan_out), jnp.float32, -bound, bound)
        return w, b

    w1, b1 = linear(k1, k2, 784, hidden_dim)
    w21, b21 = linear(k3, k4, hidden_dim, z_dim)
    w22, b22 = linear(k5, k6, hidden_dim, z_dim)
    return (w1, b1, w21, b21, w22, b22)


if __name__ == "__main__":
    key = jax.random.PRNGKey(0)
    kx, kp = jax.random.split(key)

    z_dim, hidden_dim = 16, 32
    batch = 8

    # NCHW input, like an MNIST batch
    x = jax.random.uniform(kx, (batch, 1, 28, 28), jnp.float32)
    params = init_params(kp, z_dim, hidden_dim)

    z_loc, z_scale = encoder_forward(x, params)
    jax.block_until_ready((z_loc, z_scale))

    # Reference check in plain f32 JAX (module semantics). Tolerances are
    # loosened because the kernel's fc1 runs with bf16 operands on the MXU.
    w1, b1, w21, b21, w22, b22 = params
    xf = x.reshape(-1, 784)
    hp = jax.lax.Precision.HIGHEST
    h_ref = jnp.dot(xf, w1, precision=hp) + b1
    h_ref = jnp.where(h_ref > 0, h_ref, 0.01 * h_ref)
    zloc_ref = jnp.dot(h_ref, w21, precision=hp) + b21
    zscale_ref = jnp.exp(jnp.dot(h_ref, w22, precision=hp) + b22)
    assert z_loc.shape == (batch, z_dim) and z_scale.shape == (batch, z_dim)
    assert jnp.allclose(z_loc, zloc_ref, atol=2e-2, rtol=2e-2)
    assert jnp.allclose(z_scale, zscale_ref, atol=2e-2, rtol=2e-2)

    print("KERNEL_OK")
</pallas_src>

<mosaic_0001>
module attributes {stable_mosaic.version = 11 : i64} {
  func.func @_encoder_kernel(%arg0: i32, %arg1: memref<8x784xf32, #tpu.memory_space<vmem>>, %arg2: memref<784x32xbf16, #tpu.memory_space<vmem>>, %arg3: memref<1x32xf32, #tpu.memory_space<vmem>>, %arg4: memref<32x16xf32, #tpu.memory_space<vmem>>, %arg5: memref<1x16xf32, #tpu.memory_space<vmem>>, %arg6: memref<32x16xf32, #tpu.memory_space<vmem>>, %arg7: memref<1x16xf32, #tpu.memory_space<vmem>>, %arg8: memref<8x16xf32, #tpu.memory_space<vmem>>, %arg9: memref<8x16xf32, #tpu.memory_space<vmem>>) attributes {dimension_semantics = [#tpu.dimension_semantics<parallel>], iteration_bounds = array<i64: 1>, scalar_prefetch = 0 : i64, scratch_operands = 0 : i64, tpu.core_type = #tpu.core_type<tc>, window_params = [{transform_indices = @transform_0, window_bounds = array<i64: 8, 784>}, {pipeline_mode = #tpu.pipeline_mode<synchronous>, transform_indices = @transform_1, window_bounds = array<i64: 784, 32>}, {pipeline_mode = #tpu.pipeline_mode<synchronous>, transform_indices = @transform_2, window_bounds = array<i64: 1, 32>}, {pipeline_mode = #tpu.pipeline_mode<synchronous>, transform_indices = @transform_3, window_bounds = array<i64: 32, 16>}, {pipeline_mode = #tpu.pipeline_mode<synchronous>, transform_indices = @transform_4, window_bounds = array<i64: 1, 16>}, {pipeline_mode = #tpu.pipeline_mode<synchronous>, transform_indices = @transform_5, window_bounds = array<i64: 32, 16>}, {pipeline_mode = #tpu.pipeline_mode<synchronous>, transform_indices = @transform_6, window_bounds = array<i64: 1, 16>}, {transform_indices = @transform_7, window_bounds = array<i64: 8, 16>}, {transform_indices = @transform_8, window_bounds = array<i64: 8, 16>}]} {
    %c0 = arith.constant 0 : index
    %c0_0 = arith.constant 0 : index
    %0 = vector.load %arg1[%c0, %c0_0] : memref<8x784xf32, #tpu.memory_space<vmem>>, vector<8x784xf32>
    %1 = arith.truncf %0 : vector<8x784xf32> to vector<8x784xbf16>
    %c0_1 = arith.constant 0 : index
    %c0_2 = arith.constant 0 : index
    %2 = vector.load %arg2[%c0_1, %c0_2] : memref<784x32xbf16, #tpu.memory_space<vmem>>, vector<784x32xbf16>
    %cst = arith.constant dense<0.000000e+00> : vector<8x32xf32>
    %3 = tpu.matmul %1, %2, %cst {dimension_numbers = #tpu.dot_dimension_numbers<[1], [0], [0], [1], [0, 0, 1, 1], [], []>} : vector<8x784xbf16>, vector<784x32xbf16>, vector<8x32xf32> -> vector<8x32xf32>
    %c0_3 = arith.constant 0 : index
    %c0_4 = arith.constant 0 : index
    %4 = vector.load %arg3[%c0_3, %c0_4] : memref<1x32xf32, #tpu.memory_space<vmem>>, vector<1x32xf32>
    %5 = vector.broadcast %4 : vector<1x32xf32> to vector<8x32xf32>
    %6 = arith.addf %3, %5 : vector<8x32xf32>
    %cst_5 = arith.constant 0.000000e+00 : f32
    %7 = vector.broadcast %cst_5 : f32 to vector<8x32xf32>
    %8 = arith.cmpf ogt, %6, %7 : vector<8x32xf32>
    %cst_6 = arith.constant 0.00999999977 : f32
    %9 = vector.broadcast %cst_6 : f32 to vector<8x32xf32>
    %10 = arith.mulf %9, %6 : vector<8x32xf32>
    %11 = arith.select %8, %6, %10 : vector<8x32xi1>, vector<8x32xf32>
    %c0_7 = arith.constant 0 : index
    %c0_8 = arith.constant 0 : index
    %12 = vector.load %arg4[%c0_7, %c0_8] : memref<32x16xf32, #tpu.memory_space<vmem>>, vector<32x16xf32>
    %cst_9 = arith.constant dense<0.000000e+00> : vector<8x16xf32>
    %13 = tpu.matmul %11, %12, %cst_9 {dimension_numbers = #tpu.dot_dimension_numbers<[1], [0], [0], [1], [0, 0, 1, 1], [], []>} : vector<8x32xf32>, vector<32x16xf32>, vector<8x16xf32> -> vector<8x16xf32>
    %c0_10 = arith.constant 0 : index
    %c0_11 = arith.constant 0 : index
    %14 = vector.load %arg5[%c0_10, %c0_11] : memref<1x16xf32, #tpu.memory_space<vmem>>, vector<1x16xf32>
    %15 = vector.broadcast %14 : vector<1x16xf32> to vector<8x16xf32>
    %16 = arith.addf %13, %15 : vector<8x16xf32>
    %c0_12 = arith.constant 0 : index
    %c0_13 = arith.constant 0 : index
    %17 = vector.load %arg6[%c0_12, %c0_13] : memref<32x16xf32, #tpu.memory_space<vmem>>, vector<32x16xf32>
    %cst_14 = arith.constant dense<0.000000e+00> : vector<8x16xf32>
    %18 = tpu.matmul %11, %17, %cst_14 {dimension_numbers = #tpu.dot_dimension_numbers<[1], [0], [0], [1], [0, 0, 1, 1], [], []>} : vector<8x32xf32>, vector<32x16xf32>, vector<8x16xf32> -> vector<8x16xf32>
    %c0_15 = arith.constant 0 : index
    %c0_16 = arith.constant 0 : index
    %19 = vector.load %arg7[%c0_15, %c0_16] : memref<1x16xf32, #tpu.memory_space<vmem>>, vector<1x16xf32>
    %20 = vector.broadcast %19 : vector<1x16xf32> to vector<8x16xf32>
    %21 = arith.addf %18, %20 : vector<8x16xf32>
    %22 = math.exp %21 : vector<8x16xf32>
    %c0_17 = arith.constant 0 : index
    %c0_18 = arith.constant 0 : index
    %23 = vector.load %arg8[%c0_17, %c0_18] : memref<8x16xf32, #tpu.memory_space<vmem>>, vector<8x16xf32>
    tpu.vector_store %arg8[%c0_17, %c0_18], %16 {strides = array<i32>} : memref<8x16xf32, #tpu.memory_space<vmem>>, vector<8x16xf32>,
    %c0_19 = arith.constant 0 : index
    %c0_20 = arith.constant 0 : index
    %24 = vector.load %arg9[%c0_19, %c0_20] : memref<8x16xf32, #tpu.memory_space<vmem>>, vector<8x16xf32>
    tpu.vector_store %arg9[%c0_19, %c0_20], %22 {strides = array<i32>} : memref<8x16xf32, #tpu.memory_space<vmem>>, vector<8x16xf32>,
    return
  }
  func.func @transform_0(%arg0: i32) -> (i32, i32) {
    %c0_i32 = arith.constant 0 : i32
    %c0_i32_0 = arith.constant 0 : i32
    return %arg0, %c0_i32 : i32, i32
  }
  func.func @transform_1(%arg0: i32) -> (i32, i32) {
    %c0_i32 = arith.constant 0 : i32
    %c0_i32_0 = arith.constant 0 : i32
    %c0_i32_1 = arith.constant 0 : i32
    return %c0_i32, %c0_i32_0 : i32, i32
  }
  func.func @transform_2(%arg0: i32) -> (i32, i32) {
    %c0_i32 = arith.constant 0 : i32
    %c0_i32_0 = arith.constant 0 : i32
    %c0_i32_1 = arith.constant 0 : i32
    return %c0_i32, %c0_i32_0 : i32, i32
  }
  func.func @transform_3(%arg0: i32) -> (i32, i32) {
    %c0_i32 = arith.constant 0 : i32
    %c0_i32_0 = arith.constant 0 : i32
    %c0_i32_1 = arith.constant 0 : i32
    return %c0_i32, %c0_i32_0 : i32, i32
  }
  func.func @transform_4(%arg0: i32) -> (i32, i32) {
    %c0_i32 = arith.constant 0 : i32
    %c0_i32_0 = arith.constant 0 : i32
    %c0_i32_1 = arith.constant 0 : i32
    return %c0_i32, %c0_i32_0 : i32, i32
  }
  func.func @transform_5(%arg0: i32) -> (i32, i32) {
    %c0_i32 = arith.constant 0 : i32
    %c0_i32_0 = arith.constant 0 : i32
    %c0_i32_1 = arith.constant 0 : i32
    return %c0_i32, %c0_i32_0 : i32, i32
  }
  func.func @transform_6(%arg0: i32) -> (i32, i32) {
    %c0_i32 = arith.constant 0 : i32
    %c0_i32_0 = arith.constant 0 : i32
    %c0_i32_1 = arith.constant 0 : i32
    return %c0_i32, %c0_i32_0 : i32, i32
  }
  func.func @transform_7(%arg0: i32) -> (i32, i32) {
    %c0_i32 = arith.constant 0 : i32
    %c0_i32_0 = arith.constant 0 : i32
    return %arg0, %c0_i32 : i32, i32
  }
  func.func @transform_8(%arg0: i32) -> (i32, i32) {
    %c0_i32 = arith.constant 0 : i32
    %c0_i32_0 = arith.constant 0 : i32
    return %arg0, %c0_i32 : i32, i32
  }
}

</mosaic_0001>

<bundles_post_ra>
// kernel: tpu_custom_call.1
= control target key start
LH: loop header
LB: loop body
LE: loop exit
PB: predicated region body
PF: predicated region fallthrough
CT: control target
= control target key end

     0   :  { %14 = vsyncpa [#allocation3], 0  ;;  %v1086_v44 = vmov 0.0   ;;  %vm1087_vm0 = vmmov 0   ;;  %s1371_s0 = inlined_call_operand.vmem [shape: f32[8,784], index: 0, kind: input, shape index: {}]   ;;  %s1372_s1 = inlined_call_operand.vmem [shape: bf16[784,32], index: 1, kind: input, shape index: {}]   ;;  %s1373_s2 = inlined_call_operand.vmem [shape: f32[1,32], index: 2, kind: input, shape index: {}]   ;;  %s1374_s3 = inlined_call_operand.vmem [shape: f32[32,16], index: 3, kind: input, shape index: {}]   ;;  %s1375_s4 = inlined_call_operand.vmem [shape: f32[1,16], index: 4, kind: input, shape index: {}]   ;;  %s1376_s5 = inlined_call_operand.vmem [shape: f32[32,16], index: 5, kind: input, shape index: {}]   ;;  %s1377_s6 = inlined_call_operand.vmem [shape: f32[1,16], index: 6, kind: input, shape index: {}]   ;;  %s1378_s7 = inlined_call_operand.hbm [shape: f32[8,16], index: 7, kind: output, shape index: {0}]   ;;  %s1379_s8 = inlined_call_operand.hbm [shape: f32[8,16], index: 8, kind: output, shape index: {1}]  }
   0x1   :  { %v987_v0 = vld [vmem:[%s1372_s1 + $0x40] sm:$0xff]   ;;  %v991_v4 = vld [vmem:[%s1372_s1 + $0x48] sm:$0xff]   ;;  %v995_v8 = vld [vmem:[%s1372_s1 + $0x50] sm:$0xff]  }
   0x2   :  { %v988_v1 = vld [vmem:[%s1372_s1] sm:$0xff]   ;;  %864 = vmatprep.subr.bf16.mxu0 %v987_v0  ;;  %v992_v5 = vld [vmem:[%s1372_s1 + $0x8] sm:$0xff]   ;;  %v996_v9 = vld [vmem:[%s1372_s1 + $0x10] sm:$0xff]  }
   0x3   :  { %v989_v2 = vld [vmem:[%s1372_s1 + $0xc0] sm:$0xff]   ;;  %865 = vmatpush3.bf16.msra.mxu0 %v988_v1  ;;  %v993_v6 = vld [vmem:[%s1372_s1 + $0xc8] sm:$0xff]   ;;  %v997_v10 = vld [vmem:[%s1372_s1 + $0xd0] sm:$0xff]  }
   0x4   :  { %v990_v3 = vld [vmem:[%s1372_s1 + $0x80] sm:$0xff]   ;;  %886 = vmatprep.subr.bf16.mxu1 %v989_v2  ;;  %866 = vmatprep.subr.bf16.mxu0 %v991_v4  ;;  %v994_v7 = vld [vmem:[%s1372_s1 + $0x88] sm:$0xff]   ;;  %v998_v11 = vld [vmem:[%s1372_s1 + $0x90] sm:$0xff]  }
   0x5   :  { %887 = vmatpush3.bf16.msra.mxu1 %v990_v3  ;;  %v999_v12 = vld [vmem:[%s1372_s1 + $0x58] sm:$0xff]   ;;  %v1003_v16 = vld [vmem:[%s1372_s1 + $0x60] sm:$0xff]   ;;  %v1007_v20 = vld [vmem:[%s1372_s1 + $0x68] sm:$0xff]  }
   0x6   :  { %888 = vmatprep.subr.bf16.mxu1 %v993_v6  ;;  %v1000_v13 = vld [vmem:[%s1372_s1 + $0x18] sm:$0xff]   ;;  %v1004_v17 = vld [vmem:[%s1372_s1 + $0x20] sm:$0xff]   ;;  %v1008_v21 = vld [vmem:[%s1372_s1 + $0x28] sm:$0xff]  }
   0x7   :  { %867 = vmatpush3.bf16.msra.mxu0 %v992_v5  ;;  %v1001_v14 = vld [vmem:[%s1372_s1 + $0xd8] sm:$0xff]   ;;  %v1005_v18 = vld [vmem:[%s1372_s1 + $0xe0] sm:$0xff]   ;;  %v1009_v22 = vld [vmem:[%s1372_s1 + $0xe8] sm:$0xff]  }
   0x8   :  { %868 = vmatprep.subr.bf16.mxu0 %v995_v8  ;;  %v1002_v15 = vld [vmem:[%s1372_s1 + $0x98] sm:$0xff]   ;;  %v1006_v19 = vld [vmem:[%s1372_s1 + $0xa0] sm:$0xff]   ;;  %v1010_v23 = vld [vmem:[%s1372_s1 + $0xa8] sm:$0xff]  }
   0x9   :  { %889 = vmatpush3.bf16.msra.mxu1 %v994_v7  ;;  %v1011_v24 = vld [vmem:[%s1372_s1 + $0x70] sm:$0xff]   ;;  %v1015_v28 = vld [vmem:[%s1372_s1 + $0x78] sm:$0xff]   ;;  %v32_v31 = vld [vmem:[%s1371_s0 + $0x8] sm:$0xff] }
   0xa   :  { %890 = vmatprep.subr.bf16.mxu1 %v997_v10  ;;  %v1012_v25 = vld [vmem:[%s1372_s1 + $0x30] sm:$0xff]   ;;  %v1016_v29 = vld [vmem:[%s1372_s1 + $0x38] sm:$0xff]   ;;  %v39_v32 = vpack.c.bf16 %v32_v31, %v32_v31  ;;  %v31_v34 = vld [vmem:[%s1371_s0] sm:$0xff] }
   0xb   :  { %869 = vmatpush3.bf16.msra.mxu0 %v996_v9  ;;  %v1013_v26 = vld [vmem:[%s1372_s1 + $0xf0] sm:$0xff]   ;;  %v1017_v30 = vld [vmem:[%s1372_s1 + $0xf8] sm:$0xff]   ;;  %v38_v35 = vpack.c.bf16 %v31_v34, %v31_v34  ;;  %v1019_v36 = vld [vmem:[%s1372_s1 + $0x140] sm:$0xff]  }
   0xc   :  { %870 = vmatprep.subr.bf16.mxu0 %v999_v12  ;;  %v1014_v27 = vld [vmem:[%s1372_s1 + $0xb0] sm:$0xff]   ;;  %v1018_v33 = vld [vmem:[%s1372_s1 + $0xb8] sm:$0xff]   ;;  %480 = vmatprep.mubr.bf16.mxu0 %v39_v32  ;;  %v1020_v39 = vld [vmem:[%s1372_s1 + $0x100] sm:$0xff]  }
   0xd   :  { %891 = vmatpush3.bf16.msra.mxu1 %v998_v11  ;;  %v34_v37 = vld [vmem:[%s1371_s0 + $0x18] sm:$0xff]  ;;  %v33_v40 = vld [vmem:[%s1371_s0 + $0x10] sm:$0xff]  ;;  %v1021_v42 = vld [vmem:[%s1372_s1 + $0x148] sm:$0xff]  }
   0xe   :  { %892 = vmatprep.subr.bf16.mxu1 %v1001_v14  ;;  %v41_v38 = vpack.c.bf16 %v34_v37, %v34_v37  ;;  %v40_v41 = vpack.c.bf16 %v33_v40, %v33_v40  ;;  %v1022_v43 = vld [vmem:[%s1372_s1 + $0x108] sm:$0xff]   ;;  %v1023_v45 = vld [vmem:[%s1372_s1 + $0x150] sm:$0xff]   ;;  %v1025_v47 = vld [vmem:[%s1372_s1 + $0x158] sm:$0xff]  }
   0xf   :  { %871 = vmatpush3.bf16.msra.mxu0 %v1000_v13  ;;  %v1024_v46 = vld [vmem:[%s1372_s1 + $0x110] sm:$0xff]   ;;  %v1026_v48 = vld [vmem:[%s1372_s1 + $0x118] sm:$0xff]   ;;  %v1027_v49 = vld [vmem:[%s1372_s1 + $0x160] sm:$0xff]  }
  0x10   :  { %872 = vmatprep.subr.bf16.mxu0 %v1003_v16  ;;  %520 = vmatprep.mubr.bf16.mxu1 %v41_v38  ;;  %v1028_v50 = vld [vmem:[%s1372_s1 + $0x120] sm:$0xff]   ;;  %v1029_v51 = vld [vmem:[%s1372_s1 + $0x168] sm:$0xff]   ;;  %v37_v55 = vld [vmem:[%s1371_s0 + $0x30] sm:$0xff] }
  0x11   :  { %893 = vmatpush3.bf16.msra.mxu1 %v1002_v15  ;;  %v1035_v52 = vld [vmem:[%s1372_s1 + $0x180] sm:$0xff]   ;;  %v36_v53 = vld [vmem:[%s1371_s0 + $0x28] sm:$0xff] }
  0x12   :  { %894 = vmatprep.subr.bf16.mxu1 %v1005_v18  ;;  %v43_v54 = vpack.c.bf16 %v36_v53, %v36_v53 }
  0x13   :  { %873 = vmatpush3.bf16.msra.mxu0 %v1004_v17 }
  0x14   :  { %874 = vmatprep.subr.bf16.mxu0 %v1007_v20 }
  0x15   :  { %895 = vmatpush3.bf16.msra.mxu1 %v1006_v19 }
  0x16   :  { %896 = vmatprep.subr.bf16.mxu1 %v1009_v22 }
  0x17   :  { %875 = vmatpush3.bf16.msra.mxu0 %v1008_v21 }
  0x18   :  { %876 = vmatprep.subr.bf16.mxu0 %v1011_v24 }
  0x19   :  { %897 = vmatpush3.bf16.msra.mxu1 %v1010_v23 }
  0x1a   :  { %898 = vmatprep.subr.bf16.mxu1 %v1013_v26 }
  0x1b   :  { %877 = vmatpush3.bf16.msra.mxu0 %v1012_v25 }
  0x1c   :  { %878 = vmatprep.subr.bf16.mxu0 %v1015_v28 }
  0x1d   :  { %899 = vmatpush3.bf16.msra.mxu1 %v1014_v27 }
  0x1e   :  { %900 = vmatprep.subr.bf16.mxu1 %v1017_v30 }
  0x1f   :  { %879 = vmatpush3.bf16.msra.mxu0 %v1016_v29 }
  0x20   :  { %908 = vmatprep.subr.bf16.mxu0 %v1019_v36 }
  0x21   :  { %901 = vmatpush3.bf16.msra.mxu1 %v1018_v33 }
  0x22   :  { %481 = vmatmul.mubr.bf16.vlgmr.msra.gmra.mrb[0].mxu0 %v38_v35  ;;  %942 = vmatprep.subr.bf16.mxu1 %v1086_v44 }
  0x23   :  { %909 = vmatpush3.bf16.msra.mxu0 %v1020_v39 }
  0x24   :  { %521 = vmatmul.mubr.bf16.vlgmr.msra.gmra.mrb[0].mxu1 %v40_v41  ;;  %910 = vmatprep.subr.bf16.mxu0 %v1021_v42 }
  0x25   :  { %944 = vmatprep.mubr.msk.bf16.mxu1 %vm1087_vm0, %v1086_v44 }
  0x27   :  { %911 = vmatpush3.bf16.msra.mxu0 %v1022_v43 }
  0x28   :  { %912 = vmatprep.subr.bf16.mxu0 %v1023_v45 }
  0x2b   :  { %913 = vmatpush3.bf16.msra.mxu0 %v1024_v46 }
  0x2c   :  { %914 = vmatprep.subr.bf16.mxu0 %v1025_v47 }
  0x2f   :  { %915 = vmatpush3.bf16.msra.mxu0 %v1026_v48 }
  0x30   :  { %916 = vmatprep.subr.bf16.mxu0 %v1027_v49 }
  0x31   :  { %15 = vsyncpa [#allocation5], 0  ;;  %v1030_v56 = vld [vmem:[%s1372_s1 + $0x128] sm:$0xff]   ;;  %943 = vmatpush3.bf16.msra.mxu1 %v1035_v52  ;;  %v44_v57 = vpack.c.bf16 %v37_v55, %v37_v55  ;;  %vm444_vm1 = vcmask 130048   ;;  %v1031_v58 = vld [vmem:[%s1372_s1 + $0x170] sm:$0xff]   ;;  %560 = vmatprep.mubr.bf16.mxu0 %v43_v54  ;;  %v1088_v3 = vmov 0.0|0.0  }
  0x32   :  { %v1032_v59 = vld [vmem:[%s1372_s1 + $0x130] sm:$0xff]   ;;  %v1033_v60 = vld [vmem:[%s1372_s1 + $0x178] sm:$0xff]   ;;  %v35_v62 = vld [vmem:[%s1371_s0 + $0x20] sm:$0xff]  ;;  %970 = vmatprep.subr.bf16.mxu1 %v1088_v3  ;;  %vm622_vm3 = vcmask 261120   ;;  %s1089_s23 = smov [#allocation2]  }
  0x33   :  { %917 = vmatpush3.bf16.msra.mxu0 %v1028_v50  ;;  %v1034_v61 = vld [vmem:[%s1372_s1 + $0x138] sm:$0xff]   ;;  %v42_v63 = vpack.c.bf16 %v35_v62, %v35_v62  ;;  %v611_v0 = vld [vmem:[%s1374_s3] sm:$0xff]  ;;  %v612_v1 = vld [vmem:[%s1374_s3 + $0x8] sm:$0xff]  ;;  %s787_s24 = sshll.u32 %s1089_s23, 4  ;;  %s788_s24 = int_to_ptr.vmem [resolvable:$true] %s787_s24 }
  0x34   :  { %918 = vmatprep.subr.bf16.mxu0 %v1029_v51  ;;  %945 = vmatmul.mubr.msk.bf16.vlgmr.msra.gmra.mrb[4].mxu1 %vm444_vm1, %v44_v57  ;;  %v971_v2 = vpack.c.bf16 %v612_v1, %v611_v0  ;;  %v613_v4 = vld [vmem:[%s1374_s3 + $0x10] sm:$0xff]  ;;  %v614_v5 = vld [vmem:[%s1374_s3 + $0x18] sm:$0xff]  ;;  %v809_v8 = vld [vmem:[%s1373_s2] ss:$0 sm:$0xff]  ;;  %p1043_p1 = scmp.lt.s32.totalorder %s788_s24, %s788_s24 }
  0x35   :  { %956 = vmatprep.mubr.msk.f32.mxu1 %vm1087_vm0, %v1086_v44  ;;  %v974_v6 = vpack.c.bf16 %v614_v5, %v613_v4  ;;  %v696_v30 = vld [vmem:[%s1376_s5] sm:$0xff]  ;;  %v697_v31 = vld [vmem:[%s1376_s5 + $0x8] sm:$0xff]  ;;  %v698_v35 = vld [vmem:[%s1376_s5 + $0x10] sm:$0xff] }
  0x36   :  { %972 = vmatpush3.bf16.msra.mxu1 %v971_v2  ;;  %v977_v34 = vpack.c.bf16 %v697_v31, %v696_v30  ;;  %v699_v36 = vld [vmem:[%s1376_s5 + $0x18] sm:$0xff]  ;;  %v860_v39 = vld [vmem:[%s1375_s4] ss:$0 sm:$0xff]  ;;  %s1038_s5 = scalar_lea.vmem %s788_s24, 128 }
  0x37   :  { %919 = vmatpush3.bf16.msra.mxu0 %v1030_v56  ;;  %973 = vmatprep.subr.bf16.mxu1 %v1088_v3  ;;  %v980_v38 = vpack.c.bf16 %v699_v36, %v698_v35  ;;  %p1039_p0 = scmp.ne.s32.totalorder %s788_s24, %s1038_s5  ;;  %p1044_p2 = scmp.lt.s32.totalorder %s1038_s5, %s1038_s5 }
  0x38   :  { %920 = vmatprep.subr.bf16.mxu0 %v1031_v58 }
  0x39   :  { %p1045_p3 = por %p1044_p2, %p1043_p1 }
  0x3a   :  { %975 = vmatpush3.bf16.msra.mxu1 %v974_v6 }
  0x3b   :  { %921 = vmatpush3.bf16.msra.mxu0 %v1032_v59  ;;  %976 = vmatprep.subr.bf16.mxu1 %v1088_v3  ;;  %p1046_p4 = pnand %p1045_p3, %p1039_p0 }
  0x3c   :  { %922 = vmatprep.subr.bf16.mxu0 %v1033_v60 }
  0x3f   :  { %923 = vmatpush3.bf16.msra.mxu0 %v1034_v61 }
  0x42   :  { %561 = vmatmul.mubr.bf16.vlgmr.msra.gmra.mrb[4].mxu0 %v42_v63 }
  0xf5   :  { %v880_v7 = vpop.f32.mrb[0].mxu0 }
  0xf6   :  { %v881_v9 = vpop.f32.mrb[1].mxu0 }
  0xf7   :  { %v882_v10 = vadd.f32 %v881_v9, %v880_v7  ;;  %v883_v11 = vpop.f32.mrb[2].mxu0  ;;  %v902_v12 = vpop.f32.mrb[0].mxu1 }
  0xf8   :  { %v884_v13 = vpop.f32.mrb[3].mxu0  ;;  %v903_v15 = vpop.f32.mrb[1].mxu1 }
  0xf9   :  { %v483_v14 = vadd.f32 %v882_v10, %v809_v8  ;;  %v904_v16 = vadd.f32 %v903_v15, %v902_v12  ;;  %v905_v17 = vpop.f32.mrb[2].mxu1 }
  0xfa   :  { %v906_v18 = vpop.f32.mrb[3].mxu1 }
  0xfb   :  { %v523_v19 = vadd.f32 %v904_v16, %v483_v14 }
 0x107   :  { %v602_v20 = vpop.f32.mrb[4].mxu1 }
 0x108   :  { %v946_v21 = vpop.f32.mrb[5].mxu1 }
 0x109   :  { %v605_v22 = vpop.f32.mrb[6].mxu1 }
 0x10a   :  { %v947_v23 = vpop.f32.mrb[7].mxu1 }
 0x115   :  { %v924_v24 = vpop.f32.mrb[4].mxu0 }
 0x116   :  { %v925_v25 = vpop.f32.mrb[5].mxu0 }
 0x117   :  { %v926_v26 = vadd.f32 %v925_v25, %v924_v24  ;;  %v927_v27 = vpop.f32.mrb[6].mxu0 }
 0x118   :  { %v928_v28 = vpop.f32.mrb[7].mxu0 }
 0x119   :  { %v563_v29 = vadd.f32 %v926_v26, %v523_v19 }
 0x11b   :  { %v603_v32 = vadd.f32 %v602_v20, %v563_v29 }
 0x11d   :  { %vm608_vm2 = vcmp.gt.f32.partialorder %v603_v32, 0.0  ;;  %v609_v33 = vmul.f32 0.01, %v603_v32 }
 0x11f   :  { %v610_v37 = vsel %vm608_vm2, %v603_v32, %v609_v33 }
 0x120   :  { %957 = vmatmul.mubr.msk.f32.vlgmr.msra.gmra.mrb[8].mxu1 %vm622_vm3, %v610_v37 }
 0x121   :  { %978 = vmatpush3.bf16.msra.mxu1 %v977_v34  ;;  %967 = vmatprep.mubr.msk.f32.mxu1 %vm1087_vm0, %v1086_v44 }
 0x122   :  { %979 = vmatprep.subr.bf16.mxu1 %v1088_v3 }
 0x125   :  { %981 = vmatpush3.bf16.msra.mxu1 %v980_v38 }
 0x128   :  { %968 = vmatmul.mubr.msk.f32.vlgmr.msra.gmra.mrb[10].mxu1 %vm622_vm3, %v610_v37 }
 0x1f3   :  { %v692_v40 = vpop.f32.mrb[8].mxu1 }
 0x1f4   :  { %v693_v41 = vadd.f32 %v860_v39, %v692_v40  ;;  %v958_v42 = vpop.f32.mrb[9].mxu1 }
 0x1f6   :  { %779 = vst.msk [vmem:[#allocation2] sm:$0xff] %vm444_vm1, %v693_v41 }
 0x1f7   :  { %1049 = shalt.err (!%p1046_p4)
}
 0x1f8   :  { %s1050_s27 = scalar_lea.hbm %s1378_s7, 128 }
 0x1f9   :  { %p1051_p5 = scmp.ne.s32.totalorder %s1378_s7, %s1050_s27  ;;  %p1054_p6 = scmp.lt.u32.totalorder %s1050_s27, %s1378_s7 }
 0x1fb   :  { %p1056_p7 = pnand %p1054_p6, %p1051_p5 }
 0x1fd   :  { %1059 = shalt.err (!%p1056_p7)
}
 0x1fe   :  { %790 = dma.vmem_to_hbm [thread:$0]  %s788_s24, 128, %s1378_s7, [#allocation3]   ;;  %v862_v43 = vld [vmem:[%s1377_s6] ss:$0 sm:$0xff]  ;;  %v773_v44 = vpop.f32.mrb[10].mxu1 }
 0x1ff   :  { %v774_v45 = vadd.f32 %v862_v43, %v773_v44  ;;  %v969_v46 = vpop.f32.mrb[11].mxu1  ;;  %s1090_s0 = smov [#allocation4]  }
 0x200   :  { %s797_s12 = sshll.u32 %s1090_s0, 4  ;;  %s798_s12 = int_to_ptr.vmem [resolvable:$true] %s797_s12 }
 0x201   :  { %v777_v47 = vmul.f32 1.442695, %v774_v45  ;;  %s1060_s13 = scalar_lea.vmem %s798_s12, 128  ;;  %p1065_p9 = scmp.lt.s32.totalorder %s798_s12, %s798_s12 }
 0x202   :  { %p1061_p8 = scmp.ne.s32.totalorder %s798_s12, %s1060_s13  ;;  %p1066_p10 = scmp.lt.s32.totalorder %s1060_s13, %s1060_s13 }
 0x203   :  { %1036 = vpow2.f32 %v777_v47 }
 0x204   :  { %p1067_p11 = por %p1066_p10, %p1065_p9 }
 0x206   :  { %p1068_p12 = pnand %p1067_p11, %p1061_p8 }
 0x20d   :  { %v1037_v48 = vpop.eup %1036 }
 0x20e   :  { %780 = vst.msk [vmem:[#allocation4] sm:$0xff] %vm444_vm1, %v1037_v48 }
 0x20f   :  { %1071 = shalt.err (!%p1068_p12)
}
 0x210   :  { %s1072_s14 = scalar_lea.hbm %s1379_s8, 128 }
 0x211   :  { %p1073_p13 = scmp.ne.s32.totalorder %s1379_s8, %s1072_s14  ;;  %p1076_p0 = scmp.lt.u32.totalorder %s1072_s14, %s1379_s8 }
 0x213   :  { %p1078_p1 = pnand %p1076_p0, %p1073_p13 }
 0x215   :  { %1081 = shalt.err (!%p1078_p1)
}
 0x216   :  { %800 = dma.vmem_to_hbm [thread:$0]  %s798_s12, 128, %s1379_s8, [#allocation5]  }
 0x217   :  { %1082 = dma.done.wait [#allocation3], 128  }
 0x218   :  { %1083 = vsyncadd [#allocation3], 4294967168 }
 0x219   :  { %1084 = dma.done.wait [#allocation5], 128  }
 0x21a   :  { %1085 = vsyncadd [#allocation5], 4294967168 }
 0x21b   :  { %807 = vsyncpa [#allocation3], 1 }
 0x21c   :  { %808 = vsyncpa [#allocation5], 1 }

</bundles_post_ra>
